<compile_context>
chip_gen: v6e
topology: v6e:2x2x1
jax: 0.10.0
libtpu: 0.0.40
codegen_flags: <defaults>
</compile_context>

<pallas_src>
import functools
import math

import jax
import jax.numpy as jnp
from jax import lax
from jax.experimental import pallas as pl
from jax.experimental.pallas import tpu as pltpu

_LANE = 128


def _round_up(x, m):
    return ((x + m - 1) // m) * m


def _silu(x):
    return x * (1.0 / (1.0 + jnp.exp(-x)))


def _mlp_table_kernel(*args, depth, norm, log_distance, N, chunk):
    """One lane-chunk of the per-offset MLP table: rt[h, m] = MLP(N - 1 - m).

    Feature axis on sublanes, offset axis on lanes, so the output block is
    directly (heads, chunk) and PyTorch (out, in) weights are used as-is.
    """
    refs = args[:-1]
    out_ref = args[-1]
    s = pl.program_id(0)

    lane = lax.broadcasted_iota(jnp.int32, (1, chunk), 1)
    pos = ((N - 1) - (s * chunk + lane)).astype(jnp.float32)        # (1, chunk)
    if log_distance:
        sign = jnp.where(pos > 0.0, 1.0, jnp.where(pos < 0.0, -1.0, 0.0))
        pos = sign * jnp.log(jnp.abs(pos) + 1.0)

    idx = 0
    w = refs[idx][...]            # (dim, 1)
    b = refs[idx + 1][...]        # (dim, 1)
    idx += 2
    x = w * pos + b                                                  # (dim, chunk)
    if norm:
        g = refs[idx][...]
        be = refs[idx + 1][...]
        idx += 2
        mu = jnp.mean(x, axis=0, keepdims=True)
        var = jnp.mean((x - mu) ** 2, axis=0, keepdims=True)
        x = (x - mu) * lax.rsqrt(var + 1e-5) * g + be
    x = _silu(x)

    for _ in range(depth - 1):
        w = refs[idx][...]        # (dim, dim)   (PyTorch (out, in))
        b = refs[idx + 1][...]    # (dim, 1)
        idx += 2
        x = jnp.dot(w, x, preferred_element_type=jnp.float32) + b
        if norm:
            g = refs[idx][...]
            be = refs[idx + 1][...]
            idx += 2
            mu = jnp.mean(x, axis=0, keepdims=True)
            var = jnp.mean((x - mu) ** 2, axis=0, keepdims=True)
            x = (x - mu) * lax.rsqrt(var + 1e-5) * g + be
        x = _silu(x)

    w = refs[idx][...]            # (heads, dim)
    b = refs[idx + 1][...]        # (heads, 1)
    out_ref[...] = jnp.dot(w, x, preferred_element_type=jnp.float32) + b


def _expand_kernel(*args, k, TI, TJ):
    """Fill one (heads, TI, TJ) output tile from the per-tile table window.

    The window (length TI+TJ, 128-aligned start) arrives as k consecutive
    128-wide blocks; rows are static, unaligned slices of it.
    """
    tab_refs = args[:k]
    out_ref = args[k]
    win_ref = args[k + 1]

    for m in range(k):
        win_ref[:, m * _LANE:(m + 1) * _LANE] = tab_refs[m][...]
    win = win_ref[...]                         # (heads, TI + TJ)

    for r in range(TI):                        # static unroll -> static slices
        a = TI - 1 - r
        out_ref[:, r, :] = win[:, a:a + TJ].astype(out_ref.dtype)


def dynamic_position_bias(layers, qlen, klen, *, log_distance=False, norm=False,
                          out_dtype=jnp.float32):
    """Pallas forward of DynamicPositionBias. Returns (heads, qlen, klen)."""
    assert qlen == klen, "DynamicPositionBias requires qlen == klen"
    n = int(qlen)
    depth = len(layers) - 1
    heads = layers[-1]["W"].shape[0]

    N = max(_LANE, _round_up(n, _LANE))        # padded length (multiple of 128)
    Lp = 2 * N                                 # table length (last entry unused)

    # ---------------- kernel 1: per-offset MLP table ----------------
    flat = []
    for li in range(depth):
        flat.append(jnp.asarray(layers[li]["W"], jnp.float32))
        flat.append(jnp.asarray(layers[li]["b"], jnp.float32).reshape(-1, 1))
        if norm:
            flat.append(jnp.asarray(layers[li]["g"], jnp.float32).reshape(-1, 1))
            flat.append(jnp.asarray(layers[li]["beta"], jnp.float32).reshape(-1, 1))
    flat.append(jnp.asarray(layers[-1]["W"], jnp.float32))
    flat.append(jnp.asarray(layers[-1]["b"], jnp.float32).reshape(-1, 1))

    chunk = 256                                # Lp is always a multiple of 256
    mlp_kernel = functools.partial(
        _mlp_table_kernel, depth=depth, norm=norm, log_distance=log_distance,
        N=N, chunk=chunk)
    rt = pl.pallas_call(
        mlp_kernel,
        out_shape=jax.ShapeDtypeStruct((heads, Lp), jnp.float32),
        grid_spec=pltpu.PrefetchScalarGridSpec(
            num_scalar_prefetch=0,
            grid=(Lp // chunk,),
            in_specs=[pl.BlockSpec(p.shape, lambda s: (0, 0)) for p in flat],
            out_specs=pl.BlockSpec((heads, chunk), lambda s: (0, s)),
        ),
        compiler_params=pltpu.CompilerParams(dimension_semantics=("parallel",)),
    )(*flat)

    # ---------------- kernel 2: Toeplitz expansion -------------------
    TI = _LANE                                 # row-tile (multiple of 128)
    if N % 512 == 0:
        TJ = 512
    elif N % 256 == 0:
        TJ = 256
    else:
        TJ = 128
    k = (TI + TJ) // _LANE                     # table blocks per tile window

    def _tab_map(m):
        # window start = N - TI*(ti+1) + TJ*tj  (a multiple of 128 by design),
        # delivered as k consecutive 128-wide table blocks.
        return lambda ti, tj, m=m: (
            0, N // _LANE - (ti + 1) + (TJ // _LANE) * tj + m)

    expand = functools.partial(_expand_kernel, k=k, TI=TI, TJ=TJ)
    out = pl.pallas_call(
        expand,
        out_shape=jax.ShapeDtypeStruct((heads, N, N), out_dtype),
        grid_spec=pltpu.PrefetchScalarGridSpec(
            num_scalar_prefetch=0,
            grid=(N // TI, N // TJ),
            in_specs=[pl.BlockSpec((heads, _LANE), _tab_map(m)) for m in range(k)],
            out_specs=pl.BlockSpec((heads, TI, TJ), lambda ti, tj: (0, ti, tj)),
            scratch_shapes=[pltpu.VMEM((heads, TI + TJ), jnp.float32)],
        ),
        compiler_params=pltpu.CompilerParams(
            dimension_semantics=("parallel", "parallel")),
    )(*([rt] * k))

    if N != n:
        out = out[:, :n, :n]
    return out


# ------------------------- reference & test harness -------------------------

def _init_params(key, *, dim, heads, depth, norm=False):
    """Deterministic synthetic parameters in PyTorch (out, in) convention."""
    layers = []
    keys = jax.random.split(key, depth + 1)
    fan_in = 1
    for li in range(depth):
        kw, kb = jax.random.split(keys[li])
        layer = {
            "W": jax.random.normal(kw, (dim, fan_in), jnp.float32) / math.sqrt(fan_in),
            "b": 0.1 * jax.random.normal(kb, (dim,), jnp.float32),
        }
        if norm:
            layer["g"] = jnp.ones((dim,), jnp.float32)
            layer["beta"] = jnp.zeros((dim,), jnp.float32)
        layers.append(layer)
        fan_in = dim
    kw, kb = jax.random.split(keys[depth])
    layers.append({
        "W": jax.random.normal(kw, (heads, dim), jnp.float32) / math.sqrt(dim),
        "b": 0.1 * jax.random.normal(kb, (heads,), jnp.float32),
    })
    return layers


def _reference_bias(layers, n, *, log_distance=False, norm=False):
    """Pure-JAX mirror of the PyTorch DynamicPositionBias.forward."""
    pos = jnp.arange(-n + 1, n, dtype=jnp.float32)[:, None]         # (2n-1, 1)
    if log_distance:
        pos = jnp.sign(pos) * jnp.log(jnp.abs(pos) + 1.0)
    x = pos
    for li in range(len(layers) - 1):
        W, b = layers[li]["W"], layers[li]["b"]
        x = x @ W.T + b
        if norm:
            mu = x.mean(-1, keepdims=True)
            var = ((x - mu) ** 2).mean(-1, keepdims=True)
            x = (x - mu) / jnp.sqrt(var + 1e-5) * layers[li]["g"] + layers[li]["beta"]
        x = x * jax.nn.sigmoid(x)
    W, b = layers[-1]["W"], layers[-1]["b"]
    x = x @ W.T + b                                                  # (2n-1, heads)
    i = jnp.arange(n)
    idx = i[:, None] - i[None, :] + (n - 1)                          # (n, n)
    return jnp.transpose(x[idx], (2, 0, 1))                          # (heads, n, n)


if __name__ == "__main__":
    root = jax.random.PRNGKey(0)
    kA, kB = jax.random.split(root)

    # Config A: module defaults (log_distance=False, norm=False), tiny seq.
    heads, dim, depth, n = 8, 32, 2, 40
    layers = _init_params(kA, dim=dim, heads=heads, depth=depth)
    bias = jax.block_until_ready(dynamic_position_bias(layers, n, n))
    ref = _reference_bias(layers, n)
    assert bias.shape == (heads, n, n)
    assert jnp.allclose(bias, ref, atol=2e-3, rtol=2e-3), \
        float(jnp.max(jnp.abs(bias - ref)))

    # Config B: log-distance positions, deeper MLP, n a multiple of 128.
    heads2, dim2, depth2, n2 = 8, 64, 3, 256
    layers2 = _init_params(kB, dim=dim2, heads=heads2, depth=depth2)
    bias2 = jax.block_until_ready(
        dynamic_position_bias(layers2, n2, n2, log_distance=True))
    ref2 = _reference_bias(layers2, n2, log_distance=True)
    assert bias2.shape == (heads2, n2, n2)
    assert jnp.allclose(bias2, ref2, atol=2e-3, rtol=2e-3), \
        float(jnp.max(jnp.abs(bias2 - ref2)))

    print("KERNEL_OK")
</pallas_src>

<mosaic_0001>
module attributes {stable_mosaic.version = 11 : i64} {
  func.func @_mlp_table_kernel(%arg0: i32, %arg1: memref<32x1xf32, #tpu.memory_space<vmem>>, %arg2: memref<32x1xf32, #tpu.memory_space<vmem>>, %arg3: memref<32x32xf32, #tpu.memory_space<vmem>>, %arg4: memref<32x1xf32, #tpu.memory_space<vmem>>, %arg5: memref<8x32xf32, #tpu.memory_space<vmem>>, %arg6: memref<8x1xf32, #tpu.memory_space<vmem>>, %arg7: memref<8x256xf32, #tpu.memory_space<vmem>>) attributes {dimension_semantics = [#tpu.dimension_semantics<parallel>], iteration_bounds = array<i64: 1>, scalar_prefetch = 0 : i64, scratch_operands = 0 : i64, tpu.core_type = #tpu.core_type<tc>, window_params = [{pipeline_mode = #tpu.pipeline_mode<synchronous>, transform_indices = @transform_0, window_bounds = array<i64: 32, 1>}, {pipeline_mode = #tpu.pipeline_mode<synchronous>, transform_indices = @transform_1, window_bounds = array<i64: 32, 1>}, {pipeline_mode = #tpu.pipeline_mode<synchronous>, transform_indices = @transform_2, window_bounds = array<i64: 32, 32>}, {pipeline_mode = #tpu.pipeline_mode<synchronous>, transform_indices = @transform_3, window_bounds = array<i64: 32, 1>}, {pipeline_mode = #tpu.pipeline_mode<synchronous>, transform_indices = @transform_4, window_bounds = array<i64: 8, 32>}, {pipeline_mode = #tpu.pipeline_mode<synchronous>, transform_indices = @transform_5, window_bounds = array<i64: 8, 1>}, {transform_indices = @transform_6, window_bounds = array<i64: 8, 256>}]} {
    %0 = tpu.iota {dimensions = array<i32: 1>} : vector<1x256xi32>
    %c256_i32 = arith.constant 256 : i32
    %1 = arith.muli %arg0, %c256_i32 : i32
    %2 = vector.broadcast %1 : i32 to vector<1x256xi32>
    %3 = arith.addi %2, %0 : vector<1x256xi32>
    %c127_i32 = arith.constant 127 : i32
    %4 = vector.broadcast %c127_i32 : i32 to vector<1x256xi32>
    %5 = arith.subi %4, %3 : vector<1x256xi32>
    %6 = arith.sitofp %5 : vector<1x256xi32> to vector<1x256xf32>
    %c0 = arith.constant 0 : index
    %c0_0 = arith.constant 0 : index
    %7 = vector.load %arg1[%c0, %c0_0] : memref<32x1xf32, #tpu.memory_space<vmem>>, vector<32x1xf32>
    %c0_1 = arith.constant 0 : index
    %c0_2 = arith.constant 0 : index
    %8 = vector.load %arg2[%c0_1, %c0_2] : memref<32x1xf32, #tpu.memory_space<vmem>>, vector<32x1xf32>
    %9 = vector.broadcast %7 : vector<32x1xf32> to vector<32x256xf32>
    %10 = vector.broadcast %6 : vector<1x256xf32> to vector<32x256xf32>
    %11 = arith.mulf %9, %10 : vector<32x256xf32>
    %12 = vector.broadcast %8 : vector<32x1xf32> to vector<32x256xf32>
    %13 = arith.addf %11, %12 : vector<32x256xf32>
    %cst = arith.constant 0.000000e+00 : f32
    %14 = vector.broadcast %cst : f32 to vector<32x256xf32>
    %15 = arith.subf %14, %13 : vector<32x256xf32>
    %16 = math.exp %15 : vector<32x256xf32>
    %cst_3 = arith.constant 1.000000e+00 : f32
    %17 = vector.broadcast %cst_3 : f32 to vector<32x256xf32>
    %18 = arith.addf %17, %16 : vector<32x256xf32>
    %cst_4 = arith.constant 1.000000e+00 : f32
    %19 = vector.broadcast %cst_4 : f32 to vector<32x256xf32>
    %20 = arith.divf %19, %18 : vector<32x256xf32>
    %21 = arith.mulf %13, %20 : vector<32x256xf32>
    %c0_5 = arith.constant 0 : index
    %c0_6 = arith.constant 0 : index
    %22 = vector.load %arg3[%c0_5, %c0_6] : memref<32x32xf32, #tpu.memory_space<vmem>>, vector<32x32xf32>
    %c0_7 = arith.constant 0 : index
    %c0_8 = arith.constant 0 : index
    %23 = vector.load %arg4[%c0_7, %c0_8] : memref<32x1xf32, #tpu.memory_space<vmem>>, vector<32x1xf32>
    %cst_9 = arith.constant dense<0.000000e+00> : vector<32x256xf32>
    %24 = tpu.matmul %22, %21, %cst_9 {dimension_numbers = #tpu.dot_dimension_numbers<[1], [0], [0], [1], [0, 0, 1, 1], [], []>} : vector<32x32xf32>, vector<32x256xf32>, vector<32x256xf32> -> vector<32x256xf32>
    %25 = vector.broadcast %23 : vector<32x1xf32> to vector<32x256xf32>
    %26 = arith.addf %24, %25 : vector<32x256xf32>
    %cst_10 = arith.constant 0.000000e+00 : f32
    %27 = vector.broadcast %cst_10 : f32 to vector<32x256xf32>
    %28 = arith.subf %27, %26 : vector<32x256xf32>
    %29 = math.exp %28 : vector<32x256xf32>
    %cst_11 = arith.constant 1.000000e+00 : f32
    %30 = vector.broadcast %cst_11 : f32 to vector<32x256xf32>
    %31 = arith.addf %30, %29 : vector<32x256xf32>
    %cst_12 = arith.constant 1.000000e+00 : f32
    %32 = vector.broadcast %cst_12 : f32 to vector<32x256xf32>
    %33 = arith.divf %32, %31 : vector<32x256xf32>
    %34 = arith.mulf %26, %33 : vector<32x256xf32>
    %c0_13 = arith.constant 0 : index
    %c0_14 = arith.constant 0 : index
    %35 = vector.load %arg5[%c0_13, %c0_14] : memref<8x32xf32, #tpu.memory_space<vmem>>, vector<8x32xf32>
    %c0_15 = arith.constant 0 : index
    %c0_16 = arith.constant 0 : index
    %36 = vector.load %arg6[%c0_15, %c0_16] : memref<8x1xf32, #tpu.memory_space<vmem>>, vector<8x1xf32>
    %cst_17 = arith.constant dense<0.000000e+00> : vector<8x256xf32>
    %37 = tpu.matmul %35, %34, %cst_17 {dimension_numbers = #tpu.dot_dimension_numbers<[1], [0], [0], [1], [0, 0, 1, 1], [], []>} : vector<8x32xf32>, vector<32x256xf32>, vector<8x256xf32> -> vector<8x256xf32>
    %38 = vector.broadcast %36 : vector<8x1xf32> to vector<8x256xf32>
    %39 = arith.addf %37, %38 : vector<8x256xf32>
    %c0_18 = arith.constant 0 : index
    %c0_19 = arith.constant 0 : index
    %40 = vector.load %arg7[%c0_18, %c0_19] : memref<8x256xf32, #tpu.memory_space<vmem>>, vector<8x256xf32>
    tpu.vector_store %arg7[%c0_18, %c0_19], %39 {strides = array<i32>} : memref<8x256xf32, #tpu.memory_space<vmem>>, vector<8x256xf32>,
    return
  }
  func.func @transform_0(%arg0: i32) -> (i32, i32) {
    %c0_i32 = arith.constant 0 : i32
    %c0_i32_0 = arith.constant 0 : i32
    %c0_i32_1 = arith.constant 0 : i32
    return %c0_i32, %c0_i32_0 : i32, i32
  }
  func.func @transform_1(%arg0: i32) -> (i32, i32) {
    %c0_i32 = arith.constant 0 : i32
    %c0_i32_0 = arith.constant 0 : i32
    %c0_i32_1 = arith.constant 0 : i32
    return %c0_i32, %c0_i32_0 : i32, i32
  }
  func.func @transform_2(%arg0: i32) -> (i32, i32) {
    %c0_i32 = arith.constant 0 : i32
    %c0_i32_0 = arith.constant 0 : i32
    %c0_i32_1 = arith.constant 0 : i32
    return %c0_i32, %c0_i32_0 : i32, i32
  }
  func.func @transform_3(%arg0: i32) -> (i32, i32) {
    %c0_i32 = arith.constant 0 : i32
    %c0_i32_0 = arith.constant 0 : i32
    %c0_i32_1 = arith.constant 0 : i32
    return %c0_i32, %c0_i32_0 : i32, i32
  }
  func.func @transform_4(%arg0: i32) -> (i32, i32) {
    %c0_i32 = arith.constant 0 : i32
    %c0_i32_0 = arith.constant 0 : i32
    %c0_i32_1 = arith.constant 0 : i32
    return %c0_i32, %c0_i32_0 : i32, i32
  }
  func.func @transform_5(%arg0: i32) -> (i32, i32) {
    %c0_i32 = arith.constant 0 : i32
    %c0_i32_0 = arith.constant 0 : i32
    %c0_i32_1 = arith.constant 0 : i32
    return %c0_i32, %c0_i32_0 : i32, i32
  }
  func.func @transform_6(%arg0: i32) -> (i32, i32) {
    %c0_i32 = arith.constant 0 : i32
    %c0_i32_0 = arith.constant 0 : i32
    return %c0_i32, %arg0 : i32, i32
  }
}

</mosaic_0001>

<bundles_post_ra>
// kernel: tpu_custom_call.1
= control target key start
LH: loop header
LB: loop body
LE: loop exit
PB: predicated region body
PF: predicated region fallthrough
CT: control target
= control target key end

     0   :  { %v534_v2 = vmov 0   ;;  %s675_s0 = inlined_call_operand.vmem [shape: f32[32,1], index: 0, kind: input, shape index: {}]   ;;  %s676_s1 = inlined_call_operand.vmem [shape: f32[32,1], index: 1, kind: input, shape index: {}]   ;;  %s677_s2 = inlined_call_operand.vmem [shape: f32[32,32], index: 2, kind: input, shape index: {}]   ;;  %s678_s3 = inlined_call_operand.vmem [shape: f32[32,1], index: 3, kind: input, shape index: {}]   ;;  %s679_s4 = inlined_call_operand.vmem [shape: f32[8,32], index: 4, kind: input, shape index: {}]   ;;  %s680_s5 = inlined_call_operand.vmem [shape: f32[8,1], index: 5, kind: input, shape index: {}]   ;;  %s681_s6 = inlined_call_operand.hbm [shape: f32[8,256], index: 6, kind: output, shape index: {}]  }
   0x1   :  { %v42_v0 = vld [vmem:[%s676_s1 + $0x18] sm:$0xff]  ;;  %447 = vset.pattern.permute.xlu1 %v534_v2  ;;  %446 = vset.pattern.permute.xlu0 %v534_v2  ;;  %v37_v3 = vld [vmem:[%s675_s0 + $0x10] sm:$0xff]  ;;  %v36_v4 = vld [vmem:[%s675_s0 + $0x8] sm:$0xff] }
   0x2   :  { %v38_v1 = vld [vmem:[%s675_s0 + $0x18] sm:$0xff]  ;;  %88 = vperm.xlu1 %447, %v42_v0  }
   0x3   :  { %60 = vperm.xlu0 %446, %v38_v1  }
   0x4   :  { %11 = vsyncpa [#allocation3], 0  ;;  %v41_v5 = vld [vmem:[%s676_s1 + $0x10] sm:$0xff]  ;;  %v35_v6 = vld [vmem:[%s675_s0] sm:$0xff]  ;;  %v535_v14 = vmov 0.0   ;;  %v24_v15 = vlaneseq  ;;  %vm183_vm0 = vcmask 261120  }
   0x5   :  { %v40_v7 = vld [vmem:[%s676_s1 + $0x8] sm:$0xff]  ;;  %v39_v8 = vld [vmem:[%s676_s1] sm:$0xff]  ;;  %v162_v9 = vld [vmem:[%s678_s3 + $0x18] sm:$0xff]  ;;  %260 = vmatprep.mubr.f32.mxu0 %v535_v14  ;;  %415 = vmatprep.mubr.f32.mxu1 %v535_v14  ;;  %s536_s28 = smov [#allocation2]  }
   0x6   :  { %50 = vperm.xlu1 %447, %v36_v4   ;;  %v161_v10 = vld [vmem:[%s678_s3 + $0x10] sm:$0xff]  ;;  %v160_v11 = vld [vmem:[%s678_s3 + $0x8] sm:$0xff]  ;;  %v159_v12 = vld [vmem:[%s678_s3] sm:$0xff]  ;;  %v25_v16 = vand.u32 127, %v24_v15  ;;  %s430_s29 = sshll.u32 %s536_s28, 4  ;;  %s431_s29 = int_to_ptr.vmem [resolvable:$true] %s430_s29 }
   0x7   :  { %55 = vperm.xlu0 %446, %v37_v3   ;;  %v342_v13 = vld [vmem:[%s680_s5] sm:$0xff]  ;;  %s512_s30 = scalar_lea.vmem %s431_s29, 256  ;;  %p517_p1 = scmp.lt.s32.totalorder %s431_s29, %s431_s29 }
   0x8   :  { %v26_v17 = vadd.s32 128, %v25_v16  ;;  %v31_v18 = vsub.s32 127, %v25_v16  ;;  %p513_p0 = scmp.ne.s32.totalorder %s431_s29, %s512_s30  ;;  %p518_p2 = scmp.lt.s32.totalorder %s512_s30, %s512_s30 }
   0xa   :  { %45 = vperm.xlu1 %447, %v35_v6   ;;  %v32_v19 = vsub.s32 127, %v26_v17  ;;  %v33_v20 = vcvt.s32.f32 %v31_v18  ;;  %p519_p3 = por %p518_p2, %p517_p1 }
   0xb   :  { %83 = vperm.xlu0 %446, %v41_v5  }
   0xc   :  { %v34_v21 = vcvt.s32.f32 %v32_v19  ;;  %p520_p4 = pnand %p519_p3, %p513_p0 }
   0xe   :  { %73 = vperm.xlu1 %447, %v39_v8  }
   0xf   :  { %78 = vperm.xlu0 %446, %v40_v7  }
  0x12   :  { %175 = vperm.xlu1 %447, %v161_v10  }
  0x13   :  { %180 = vperm.xlu0 %446, %v162_v9  }
  0x16   :  { %165 = vperm.xlu1 %447, %v159_v12  }
  0x17   :  { %170 = vperm.xlu0 %446, %v160_v11  }
  0x1b   :  { %345 = vperm.xlu0 %446, %v342_v13  }
  0x7d   :  { %v89_v22 = vpop.permute.xlu1 %88 }
  0x7e   :  { %v61_v23 = vpop.permute.xlu0 %60 }
  0x7f   :  { %v69_v24 = vmul.f32 %v61_v23, %v33_v20  ;;  %v70_v25 = vmul.f32 %v61_v23, %v34_v21 }
  0x81   :  { %v613_v26 = vadd.f32 %v89_v22, %v70_v25  ;;  %v615_v27 = vadd.f32 %v89_v22, %v69_v24  ;;  %v51_v29 = vpop.permute.xlu1 %50 }
  0x82   :  { %v56_v28 = vpop.permute.xlu0 %55  ;;  %v65_v40 = vmul.f32 %v51_v29, %v33_v20  ;;  %v66_v41 = vmul.f32 %v51_v29, %v34_v21 }
  0x83   :  { %v106_v30 = vsub.f32 0.0, %v613_v26  ;;  %v105_v31 = vsub.f32 0.0, %v615_v27  ;;  %v67_v32 = vmul.f32 %v56_v28, %v33_v20  ;;  %v68_v33 = vmul.f32 %v56_v28, %v34_v21 }
  0x85   :  { %v46_v35 = vpop.permute.xlu1 %45  ;;  %v121_v36 = vmul.f32 1.442695, %v106_v30  ;;  %v119_v37 = vmul.f32 1.442695, %v105_v31 }
  0x86   :  { %v84_v34 = vpop.permute.xlu0 %83  ;;  %v63_v44 = vmul.f32 %v46_v35, %v33_v20  ;;  %v64_v45 = vmul.f32 %v46_v35, %v34_v21 }
  0x87   :  { %v619_v38 = vadd.f32 %v84_v34, %v67_v32  ;;  %v621_v39 = vadd.f32 %v84_v34, %v68_v33  ;;  %448 = vpow2.f32 %v121_v36  ;;  %v156_v32 = vld [vmem:[%s677_s2 + $0x8] sm:$0xff]  ;;  %v157_v33 = vld [vmem:[%s677_s2 + $0x10] sm:$0xff]  ;;  %v158_v34 = vld [vmem:[%s677_s2 + $0x18] sm:$0xff] }
  0x88   :  { %450 = vpow2.f32 %v119_v37 }
  0x89   :  { %v103_v42 = vsub.f32 0.0, %v619_v38  ;;  %v104_v43 = vsub.f32 0.0, %v621_v39  ;;  %v74_v47 = vpop.permute.xlu1 %73 }
  0x8a   :  { %v79_v46 = vpop.permute.xlu0 %78  ;;  %v91_v52 = vadd.f32 %v74_v47, %v63_v44  ;;  %v92_v53 = vadd.f32 %v74_v47, %v64_v45 }
  0x8b   :  { %v115_v48 = vmul.f32 1.442695, %v103_v42  ;;  %v117_v49 = vmul.f32 1.442695, %v104_v43  ;;  %v93_v50 = vadd.f32 %v79_v46, %v65_v40  ;;  %v94_v51 = vadd.f32 %v79_v46, %v66_v41 }
  0x8c   :  { %v99_v56 = vsub.f32 0.0, %v91_v52  ;;  %v100_v57 = vsub.f32 0.0, %v92_v53 }
  0x8d   :  { %452 = vpow2.f32 %v115_v48  ;;  %v101_v54 = vsub.f32 0.0, %v93_v50  ;;  %v102_v55 = vsub.f32 0.0, %v94_v51  ;;  %v176_v35 = vpop.permute.xlu1 %175 }
  0x8e   :  { %454 = vpow2.f32 %v117_v49  ;;  %v107_v60 = vmul.f32 1.442695, %v99_v56  ;;  %v109_v61 = vmul.f32 1.442695, %v100_v57  ;;  %v181_v36 = vpop.permute.xlu0 %180 }
  0x8f   :  { %v111_v58 = vmul.f32 1.442695, %v101_v54  ;;  %v113_v59 = vmul.f32 1.442695, %v102_v55 }
  0x91   :  { %456 = vpow2.f32 %v111_v58 }
  0x92   :  { %458 = vpow2.f32 %v113_v59  ;;  %v171_v42 = vpop.permute.xlu0 %170 }
  0x93   :  { %460 = vpow2.f32 %v107_v60 }
  0x94   :  { %462 = vpow2.f32 %v109_v61  ;;  %v449_v62 = vpop.eup %448 }
  0x95   :  { %v451_v63 = vpop.eup %450  ;;  %v130_v0 = vadd.f32 1.0, %v449_v62 }
  0x96   :  { %v129_v1 = vadd.f32 1.0, %v451_v63 }
  0x97   :  { %464 = vrcp.f32 %v130_v0 }
  0x98   :  { %466 = vrcp.f32 %v129_v1 }
  0x9a   :  { %v453_v2 = vpop.eup %452 }
  0x9b   :  { %v455_v3 = vpop.eup %454  ;;  %v127_v4 = vadd.f32 1.0, %v453_v2 }
  0x9c   :  { %v128_v5 = vadd.f32 1.0, %v455_v3 }
  0x9d   :  { %468 = vrcp.f32 %v127_v4 }
  0x9e   :  { %v457_v6 = vpop.eup %456  ;;  %470 = vrcp.f32 %v128_v5 }
  0x9f   :  { %v459_v7 = vpop.eup %458  ;;  %v125_v8 = vadd.f32 1.0, %v457_v6 }
  0xa0   :  { %v461_v9 = vpop.eup %460  ;;  %v126_v10 = vadd.f32 1.0, %v459_v7 }
  0xa1   :  { %v463_v11 = vpop.eup %462  ;;  %472 = vrcp.f32 %v125_v8  ;;  %v123_v12 = vadd.f32 1.0, %v461_v9 }
  0xa2   :  { %474 = vrcp.f32 %v126_v10  ;;  %v124_v13 = vadd.f32 1.0, %v463_v11 }
  0xa3   :  { %476 = vrcp.f32 %v123_v12 }
  0xa4   :  { %478 = vrcp.f32 %v124_v13  ;;  %v465_v15 = vpop.eup %464 }
  0xa5   :  { %v467_v16 = vpop.eup %466  ;;  %v154_v17 = vmul.f32 %v465_v15, %v613_v26 }
  0xa6   :  { %v153_v18 = vmul.f32 %v467_v16, %v615_v27  ;;  %v155_v27 = vld [vmem:[%s677_s2] sm:$0xff] }
  0xa7   :  { %220 = vmatprep.subr.mxu0 %v154_v17 }
  0xa8   :  { %221 = vmatpush1.msra.mxu0 %v153_v18 }
  0xaa   :  { %v469_v19 = vpop.eup %468 }
  0xab   :  { %v471_v20 = vpop.eup %470  ;;  %v151_v21 = vmul.f32 %v469_v19, %v619_v38  ;;  %v166_v38 = vpop.permute.xlu1 %165 }
  0xac   :  { %v152_v22 = vmul.f32 %v471_v20, %v621_v39 }
  0xae   :  { %v473_v23 = vpop.eup %472  ;;  %222 = vmatprep.subr.mxu0 %v152_v22 }
  0xaf   :  { %v475_v24 = vpop.eup %474  ;;  %v149_v25 = vmul.f32 %v473_v23, %v93_v50  ;;  %223 = vmatpush1.msra.mxu0 %v151_v21 }
  0xb0   :  { %v477_v28 = vpop.eup %476  ;;  %v150_v29 = vmul.f32 %v475_v24, %v94_v51 }
  0xb1   :  { %v479_v30 = vpop.eup %478  ;;  %v147_v26 = vmul.f32 %v477_v28, %v91_v52 }
  0xb2   :  { %v148_v31 = vmul.f32 %v479_v30, %v92_v53  ;;  %224 = vmatprep.subr.mxu0 %v150_v29 }
  0xb3   :  { %225 = vmatpush1.msra.mxu0 %v149_v25 }
  0xb4   :  { %226 = vmatprep.subr.mxu0 %v148_v31 }
  0xb5   :  { %227 = vmatpush1.msra.mxu0 %v147_v26 }
  0xb6   :  { %438 = vmatmul.mubr.msk.f32.vlgmr.msra.gmra.mxu0 %vm183_vm0, %v155_v27 }
  0xb7   :  { %266 = vmatprep.mubr.f32.mxu0 %v535_v14 }
  0xba   :  { %439 = vmatmul.mubr.msk.f32.gmra.mxu0 %vm183_vm0, %v156_v32 }
  0xbb   :  { %272 = vmatprep.mubr.f32.mxu0 %v535_v14 }
  0xbe   :  { %440 = vmatmul.mubr.msk.f32.gmra.mxu0 %vm183_vm0, %v157_v33 }
  0xbf   :  { %278 = vmatprep.mubr.f32.mxu0 %v535_v14 }
  0xc2   :  { %441 = vmatmul.mubr.msk.f32.gmra.mxu0 %vm183_vm0, %v158_v34 }
 0x176   :  { %v262_v37 = vpop.f32.mrf.mxu0 }
 0x177   :  { %v658_v49 = vadd.f32 %v262_v37, %v166_v38 }
 0x178   :  { %v264_v39 = vpop.f32.mrf.mxu0 }
 0x179   :  { %v648_v40 = vadd.f32 %v264_v39, %v166_v38  ;;  %v285_v59 = vsub.f32 0.0, %v658_v49  ;;  %v341_v39 = vld [vmem:[%s679_s4] sm:$0xff] }
 0x17a   :  { %v268_v41 = vpop.f32.mrf.mxu0 }
 0x17b   :  { %v286_v44 = vsub.f32 0.0, %v648_v40  ;;  %v653_v14 = vadd.f32 %v268_v41, %v171_v42  ;;  %v293_v4 = vmul.f32 1.442695, %v285_v59  ;;  %v346_v41 = vpop.permute.xlu0 %345 }
 0x17c   :  { %v270_v43 = vpop.f32.mrf.mxu0 }
 0x17d   :  { %v651_v45 = vadd.f32 %v270_v43, %v171_v42  ;;  %v295_v51 = vmul.f32 1.442695, %v286_v44  ;;  %v287_v54 = vsub.f32 0.0, %v653_v14 }
 0x17e   :  { %v274_v46 = vpop.f32.mrf.mxu0 }
 0x17f   :  { %v288_v47 = vsub.f32 0.0, %v651_v45  ;;  %v656_v48 = vadd.f32 %v274_v46, %v176_v35  ;;  %480 = vpow2.f32 %v295_v51  ;;  %v297_v1 = vmul.f32 1.442695, %v287_v54 }
 0x180   :  { %v276_v50 = vpop.f32.mrf.mxu0 }
 0x181   :  { %v289_v52 = vsub.f32 0.0, %v656_v48  ;;  %v277_v53 = vadd.f32 %v276_v50, %v176_v35  ;;  %v299_v55 = vmul.f32 1.442695, %v288_v47 }
 0x182   :  { %v280_v56 = vpop.f32.mrf.mxu0 }
 0x183   :  { %v290_v57 = vsub.f32 0.0, %v277_v53  ;;  %v281_v58 = vadd.f32 %v280_v56, %v181_v36  ;;  %v301_v60 = vmul.f32 1.442695, %v289_v52  ;;  %482 = vpow2.f32 %v299_v55 }
 0x184   :  { %v282_v61 = vpop.f32.mrf.mxu0 }
 0x185   :  { %v303_v62 = vmul.f32 1.442695, %v290_v57  ;;  %v291_v63 = vsub.f32 0.0, %v281_v58  ;;  %v283_v0 = vadd.f32 %v282_v61, %v181_v36 }
 0x187   :  { %484 = vpow2.f32 %v303_v62  ;;  %v305_v2 = vmul.f32 1.442695, %v291_v63  ;;  %v292_v3 = vsub.f32 0.0, %v283_v0 }
 0x188   :  { %486 = vpow2.f32 %v301_v60 }
 0x189   :  { %488 = vpow2.f32 %v305_v2  ;;  %v307_v5 = vmul.f32 1.442695, %v292_v3 }
 0x18a   :  { %490 = vpow2.f32 %v297_v1 }
 0x18b   :  { %492 = vpow2.f32 %v307_v5 }
 0x18c   :  { %494 = vpow2.f32 %v293_v4  ;;  %v481_v6 = vpop.eup %480 }
 0x18d   :  { %v310_v21 = vadd.f32 1.0, %v481_v6 }
 0x190   :  { %v483_v7 = vpop.eup %482 }
 0x191   :  { %v312_v18 = vadd.f32 1.0, %v483_v7 }
 0x194   :  { %v485_v8 = vpop.eup %484 }
 0x195   :  { %v487_v9 = vpop.eup %486  ;;  %v314_v10 = vadd.f32 1.0, %v485_v8 }
 0x196   :  { %v489_v11 = vpop.eup %488  ;;  %v313_v16 = vadd.f32 1.0, %v487_v9 }
 0x197   :  { %v491_v12 = vpop.eup %490  ;;  %v315_v13 = vadd.f32 1.0, %v489_v11  ;;  %496 = vrcp.f32 %v314_v10 }
 0x198   :  { %v493_v15 = vpop.eup %492  ;;  %v311_v20 = vadd.f32 1.0, %v491_v12 }
 0x199   :  { %v495_v17 = vpop.eup %494  ;;  %v316_v19 = vadd.f32 1.0, %v493_v15  ;;  %498 = vrcp.f32 %v315_v13 }
 0x19a   :  { %v309_v22 = vadd.f32 1.0, %v495_v17 }
 0x19b   :  { %500 = vrcp.f32 %v316_v19 }
 0x19c   :  { %502 = vrcp.f32 %v313_v16 }
 0x19d   :  { %504 = vrcp.f32 %v312_v18 }
 0x19e   :  { %506 = vrcp.f32 %v311_v20 }
 0x19f   :  { %508 = vrcp.f32 %v310_v21 }
 0x1a0   :  { %510 = vrcp.f32 %v309_v22 }
 0x1a4   :  { %v497_v23 = vpop.eup %496 }
 0x1a5   :  { %v338_v27 = vmul.f32 %v497_v23, %v277_v53 }
 0x1a6   :  { %v499_v24 = vpop.eup %498 }
 0x1a7   :  { %v339_v31 = vmul.f32 %v499_v24, %v281_v58 }
 0x1a8   :  { %v501_v25 = vpop.eup %500 }
 0x1a9   :  { %v503_v28 = vpop.eup %502  ;;  %v340_v29 = vmul.f32 %v501_v25, %v283_v0 }
 0x1aa   :  { %v505_v30 = vpop.eup %504  ;;  %v337_v33 = vmul.f32 %v503_v28, %v656_v48 }
 0x1ab   :  { %v507_v26 = vpop.eup %506  ;;  %375 = vmatprep.subr.mxu1 %v340_v29  ;;  %v336_v35 = vmul.f32 %v505_v30, %v651_v45 }
 0x1ac   :  { %v509_v32 = vpop.eup %508  ;;  %376 = vmatpush1.msra.mxu1 %v339_v31  ;;  %v335_v36 = vmul.f32 %v507_v26, %v653_v14 }
 0x1ad   :  { %v511_v34 = vpop.eup %510  ;;  %377 = vmatprep.subr.mxu1 %v338_v27  ;;  %v334_v37 = vmul.f32 %v509_v32, %v648_v40 }
 0x1ae   :  { %378 = vmatpush1.msra.mxu1 %v337_v33  ;;  %v333_v38 = vmul.f32 %v511_v34, %v658_v49 }
 0x1af   :  { %379 = vmatprep.subr.mxu1 %v336_v35 }
 0x1b0   :  { %380 = vmatpush1.msra.mxu1 %v335_v36 }
 0x1b1   :  { %381 = vmatprep.subr.mxu1 %v334_v37 }
 0x1b2   :  { %382 = vmatpush1.msra.mxu1 %v333_v38 }
 0x1b3   :  { %442 = vmatmul.mubr.msk.f32.vlgmr.msra.gmra.mxu1 %vm183_vm0, %v341_v39 }
 0x273   :  { %v417_v42 = vpop.f32.mrf.mxu1 }
 0x274   :  { %v418_v43 = vadd.f32 %v417_v42, %v346_v41 }
 0x275   :  { %v419_v44 = vpop.f32.mrf.mxu1 }
 0x276   :  { %422 = vst [vmem:[#allocation2] sm:$0xff] %v418_v43  ;;  %v420_v40 = vadd.f32 %v419_v44, %v346_v41 }
 0x278   :  { %423 = vst [vmem:[#allocation2 + $0x8] sm:$0xff] %v420_v40 }
 0x279   :  { %523 = shalt.err (!%p520_p4)
}
 0x27a   :  { %433 = dma.vmem_to_hbm [thread:$0]  %s431_s29, 256, %s681_s6, [#allocation3]  }
 0x27b   :  { %532 = dma.done.wait [#allocation3], 256  }
 0x27c   :  { %533 = vsyncadd [#allocation3], 4294967040 }
 0x27d   :  { %437 = vsyncpa [#allocation3], 1 }

</bundles_post_ra>
